<compile_context>
chip_gen: v7x
topology: tpu7x:2x2x1
jax: 0.10.0
libtpu: 0.0.40
codegen_flags: <defaults>
</compile_context>

<pallas_src>
import jax
import jax.numpy as jnp
from jax import lax
from jax.experimental import pallas as pl
from jax.experimental.pallas import tpu as pltpu

N, C_IN, C_OUT, H, W = 2, 4, 8, 16, 16
EPS = 1e-5

ROWS = N * H                    # 32   rows    = (n, h%2, h//2)
LANES = W * C_OUT               # 128  lanes   = (w%2, w//2, c_out)
WCI = (W + 2) * C_IN            # 72   valid lanes per ky input slab
KPAD = 128                      # per-ky slab padded to a full lane tile
KDIM = 3 * KPAD                 # 384  matmul contraction depth


def down_kernel(x_ref, wt_ref, gb_ref, conv_ref, pool_ref):
    # x_ref   : (3, N, H, KPAD)  bf16  per-ky row slabs, rows already in (n, h%2, h//2)
    # wt_ref  : (KDIM, LANES)    bf16  block-Toeplitz conv weight (zero rows for padding)
    # gb_ref  : (2, LANES)       f32   row 0 = gamma, row 1 = beta, tiled so lane l holds
    #                                  the parameter of channel (l % C_OUT)
    # conv_ref: (ROWS, LANES)    f32   lane-dense conv+BN+ReLU slab
    # pool_ref: (ROWS//2, LANES) f32   lane-dense 2x2 maxpool slab (duplicated over w%2)

    # --- im2col: lane-tile-aligned concat of the three ky slabs -> (N*H, 384) patches ---
    patches = jnp.concatenate([x_ref[0], x_ref[1], x_ref[2]], axis=-1)   # (N, H, 384)
    patches = patches.reshape(ROWS, KDIM)                                # (32, 384) bf16

    # --- the whole conv as ONE bf16 MXU matmul, landing directly in output layout ---
    z = jnp.dot(patches, wt_ref[...], preferred_element_type=jnp.float32)  # (32, 128) f32

    # --- BatchNorm2d, training-mode batch stats over N*H*W, two-pass mean/variance ---
    # Lane l carries channel (l % C_OUT); folding with rolls of 64/32/16/8 leaves every
    # lane holding the sum over its mod-8 congruence class, i.e. the per-channel total,
    # already replicated across all 16 w-groups (direction of the roll is irrelevant).
    inv_n = 1.0 / float(N * H * W)
    s = jnp.sum(z, axis=0, keepdims=True)                                # (1, 128)
    for sh in (64, 32, 16, 8):
        s = s + pltpu.roll(s, shift=sh, axis=1)
    mean = s * inv_n
    d = z - mean
    ss = jnp.sum(d * d, axis=0, keepdims=True)                           # (1, 128)
    for sh in (64, 32, 16, 8):
        ss = ss + pltpu.roll(ss, shift=sh, axis=1)
    var = ss * inv_n                                                     # biased, like BN fwd
    scale = gb_ref[0:1, :] * lax.rsqrt(var + EPS)
    y = jnp.maximum(d * scale + gb_ref[1:2, :], 0.0)                     # (32, 128) f32

    conv_ref[...] = y

    # --- 2x2 / stride-2 maxpool on the dense slab ---
    # rows are (n, h%2, h//2): vertical pair-max = max of the two aligned 8-row blocks.
    vm = jnp.max(y.reshape(N, 2, H // 2, LANES), axis=1)                 # (N, 8, 128)
    vm = vm.reshape(ROWS // 2, LANES)                                    # (16, 128)
    # lanes are (w%2, w//2, c): horizontal pair-max = max with the 64-lane half swap
    # (a rotation by 64 of 128 lanes is its own inverse, so it is direction-free);
    # afterwards every lane holds a valid pooled value (duplicated over w%2).
    pool_ref[...] = jnp.maximum(vm, pltpu.roll(vm, shift=64, axis=1))    # (16, 128)


def _toeplitz_weight(w_oihw):
    """(C_OUT, C_IN, 3, 3) -> block-Toeplitz (KDIM, LANES) weight.

    Output column order is (w%2, w//2, c_out) and each ky block of rows is zero-padded
    from 72 to 128 so it lines up with the lane-padded input slabs.
    """
    w_k = jnp.transpose(w_oihw, (2, 3, 1, 0)).astype(jnp.float32)        # (ky, kx, ci, co)
    # sel[kx, p, w] = 1 iff padded column p == w + kx
    sel = jnp.stack([jnp.eye(W + 2, W, k=-kx, dtype=jnp.float32) for kx in range(3)])
    t = jnp.einsum("kpw,ykio->ypiwo", sel, w_k)                          # (3, 18, 4, 16, 8)
    t = t.reshape(3, W + 2, C_IN, W // 2, 2, C_OUT)                      # split w -> (w//2, w%2)
    t = jnp.transpose(t, (0, 1, 2, 4, 3, 5))                             # (ky, p, ci, w%2, w//2, co)
    t = t.reshape(3, WCI, LANES)                                         # (3, 72, 128)
    t = jnp.pad(t, ((0, 0), (0, KPAD - WCI), (0, 0)))                    # (3, 128, 128)
    return t.reshape(KDIM, LANES).astype(jnp.bfloat16)


@jax.jit
def down_forward(x_nchw, w_oihw, gamma, beta):
    # NCHW -> NHWC, zero-pad H/W by 1, flatten (w, c_in) into a dense 72-lane row slab.
    x = jnp.transpose(x_nchw, (0, 2, 3, 1)).astype(jnp.float32)          # (N, H, W, C_IN)
    xp = jnp.pad(x, ((0, 0), (1, 1), (1, 1), (0, 0)))                    # (N, 18, 18, 4)
    xp = xp.reshape(N, H + 2, WCI)                                       # (N, 18, 72)

    # Kernel row q maps to spatial h = 2*(q % 8) + q // 8 (all even h first), which makes
    # the in-kernel vertical pool an aligned 8-row block max.  One gathered slab per ky.
    q = jnp.arange(H)
    h_idx = 2 * (q % (H // 2)) + q // (H // 2)                           # (16,)
    xk = jnp.stack([xp[:, h_idx + ky, :] for ky in range(3)], axis=0)    # (3, N, 16, 72)
    xk = jnp.pad(xk, ((0, 0), (0, 0), (0, 0), (0, KPAD - WCI)))          # (3, N, 16, 128)
    xk = xk.astype(jnp.bfloat16)

    wt = _toeplitz_weight(w_oihw)                                        # (384, 128) bf16
    gb = jnp.stack([jnp.tile(gamma.astype(jnp.float32), W),
                    jnp.tile(beta.astype(jnp.float32), W)])              # (2, 128) f32

    conv_slab, pool_slab = pl.pallas_call(
        down_kernel,
        out_shape=(
            jax.ShapeDtypeStruct((ROWS, LANES), jnp.float32),
            jax.ShapeDtypeStruct((ROWS // 2, LANES), jnp.float32),
        ),
    )(xk, wt, gb)

    # Un-permute the lane-dense slabs back to PyTorch NCHW (pure layout plumbing).
    c = conv_slab.reshape(N, 2, H // 2, 2, W // 2, C_OUT)                # (n, h%2, h//2, w%2, w//2, co)
    conv_nhwc = jnp.transpose(c, (0, 2, 1, 4, 3, 5)).reshape(N, H, W, C_OUT)
    conv_nchw = jnp.transpose(conv_nhwc, (0, 3, 1, 2))

    p = pool_slab.reshape(N, H // 2, 2, W // 2, C_OUT)[:, :, 0, :, :]    # (n, h//2, w//2, co)
    pool_nchw = jnp.transpose(p, (0, 3, 1, 2))
    return conv_nchw, pool_nchw


def down_reference(x, w, gamma, beta):
    """Pure-JAX reference (f32) of the PyTorch Down forward."""
    z = lax.conv_general_dilated(x, w, window_strides=(1, 1),
                                 padding=((1, 1), (1, 1)),
                                 dimension_numbers=("NCHW", "OIHW", "NCHW"))
    mean = jnp.mean(z, axis=(0, 2, 3), keepdims=True)
    var = jnp.mean((z - mean) ** 2, axis=(0, 2, 3), keepdims=True)
    g = gamma.reshape(1, -1, 1, 1)
    b = beta.reshape(1, -1, 1, 1)
    y = jnp.maximum((z - mean) * lax.rsqrt(var + EPS) * g + b, 0.0)
    pool = lax.reduce_window(y, -jnp.inf, lax.max, (1, 1, 2, 2), (1, 1, 2, 2), "VALID")
    return y, pool


if __name__ == "__main__":
    key = jax.random.PRNGKey(0)
    kx, kw, kg, kb = jax.random.split(key, 4)
    # Deterministic synthetic parameters for Down(in_channels=4, out_channels=8).
    x = jax.random.normal(kx, (N, C_IN, H, W), jnp.float32)
    w = jax.random.normal(kw, (C_OUT, C_IN, 3, 3), jnp.float32) * 0.1
    gamma = 1.0 + 0.1 * jax.random.normal(kg, (C_OUT,), jnp.float32)
    beta = 0.1 * jax.random.normal(kb, (C_OUT,), jnp.float32)
    # TODO(synk): BatchNorm uses training-mode batch statistics (nn.Module default);
    # eval-mode running statistics would simply replace mean/var with constant inputs.

    conv_out, pooled = down_forward(x, w, gamma, beta)
    jax.block_until_ready((conv_out, pooled))
    assert conv_out.shape == (N, C_OUT, H, W)
    assert pooled.shape == (N, C_OUT, H // 2, W // 2)

    # Numerical self-check vs the pure-JAX reference (loose tolerance: bf16 MXU operands).
    conv_want, pool_want = down_reference(x, w, gamma, beta)
    err_c = float(jnp.max(jnp.abs(conv_out - conv_want)))
    err_p = float(jnp.max(jnp.abs(pooled - pool_want)))
    assert err_c < 0.1 and err_p < 0.1, (err_c, err_p)

    print("KERNEL_OK")
</pallas_src>

<mosaic_0001>
module attributes {stable_mosaic.version = 11 : i64} {
  func.func @down_kernel(%arg0: memref<3x2x16x128xbf16, #tpu.memory_space<vmem>>, %arg1: memref<384x128xbf16, #tpu.memory_space<vmem>>, %arg2: memref<2x128xf32, #tpu.memory_space<vmem>>, %arg3: memref<32x128xf32, #tpu.memory_space<vmem>>, %arg4: memref<16x128xf32, #tpu.memory_space<vmem>>) attributes {dimension_semantics = [], scalar_prefetch = 0 : i64, scratch_operands = 0 : i64, tpu.core_type = #tpu.core_type<tc>} {
    %c0 = arith.constant 0 : index
    %c0_0 = arith.constant 0 : index
    %c0_1 = arith.constant 0 : index
    %c0_2 = arith.constant 0 : index
    %0 = vector.load %arg0[%c0, %c0_0, %c0_1, %c0_2] : memref<3x2x16x128xbf16, #tpu.memory_space<vmem>>, vector<1x2x16x128xbf16>
    %1 = vector.shape_cast %0 : vector<1x2x16x128xbf16> to vector<2x16x128xbf16>
    %c1 = arith.constant 1 : index
    %c0_3 = arith.constant 0 : index
    %c0_4 = arith.constant 0 : index
    %c0_5 = arith.constant 0 : index
    %2 = vector.load %arg0[%c1, %c0_3, %c0_4, %c0_5] : memref<3x2x16x128xbf16, #tpu.memory_space<vmem>>, vector<1x2x16x128xbf16>
    %3 = vector.shape_cast %2 : vector<1x2x16x128xbf16> to vector<2x16x128xbf16>
    %c2 = arith.constant 2 : index
    %c0_6 = arith.constant 0 : index
    %c0_7 = arith.constant 0 : index
    %c0_8 = arith.constant 0 : index
    %4 = vector.load %arg0[%c2, %c0_6, %c0_7, %c0_8] : memref<3x2x16x128xbf16, #tpu.memory_space<vmem>>, vector<1x2x16x128xbf16>
    %5 = vector.shape_cast %4 : vector<1x2x16x128xbf16> to vector<2x16x128xbf16>
    %6 = tpu.concatenate %1, %3, %5 in 2 : vector<2x16x128xbf16>, vector<2x16x128xbf16>, vector<2x16x128xbf16> -> vector<2x16x384xbf16>
    %7 = vector.shape_cast %6 : vector<2x16x384xbf16> to vector<32x384xbf16>
    %c0_9 = arith.constant 0 : index
    %c0_10 = arith.constant 0 : index
    %8 = vector.load %arg1[%c0_9, %c0_10] : memref<384x128xbf16, #tpu.memory_space<vmem>>, vector<384x128xbf16>
    %cst = arith.constant dense<0.000000e+00> : vector<32x128xf32>
    %9 = tpu.matmul %7, %8, %cst {dimension_numbers = #tpu.dot_dimension_numbers<[1], [0], [0], [1], [0, 0, 1, 1], [], []>} : vector<32x384xbf16>, vector<384x128xbf16>, vector<32x128xf32> -> vector<32x128xf32>
    %cst_11 = arith.constant dense<0.000000e+00> : vector<128xf32>
    %10 = vector.multi_reduction <add>, %9, %cst_11 [0] : vector<32x128xf32> to vector<128xf32>
    %11 = vector.shape_cast %10 : vector<128xf32> to vector<1x128xf32>
    %c64_i32 = arith.constant 64 : i32
    %12 = tpu.dynamic_rotate %11 by %c64_i32 dim 1 : vector<1x128xf32>, i32 -> vector<1x128xf32>
    %13 = arith.addf %11, %12 : vector<1x128xf32>
    %c32_i32 = arith.constant 32 : i32
    %14 = tpu.dynamic_rotate %13 by %c32_i32 dim 1 : vector<1x128xf32>, i32 -> vector<1x128xf32>
    %15 = arith.addf %13, %14 : vector<1x128xf32>
    %c16_i32 = arith.constant 16 : i32
    %16 = tpu.dynamic_rotate %15 by %c16_i32 dim 1 : vector<1x128xf32>, i32 -> vector<1x128xf32>
    %17 = arith.addf %15, %16 : vector<1x128xf32>
    %c8_i32 = arith.constant 8 : i32
    %18 = tpu.dynamic_rotate %17 by %c8_i32 dim 1 : vector<1x128xf32>, i32 -> vector<1x128xf32>
    %19 = arith.addf %17, %18 : vector<1x128xf32>
    %cst_12 = arith.constant 0.001953125 : f32
    %20 = vector.broadcast %cst_12 : f32 to vector<1x128xf32>
    %21 = arith.mulf %19, %20 : vector<1x128xf32>
    %22 = vector.broadcast %21 : vector<1x128xf32> to vector<32x128xf32>
    %23 = arith.subf %9, %22 : vector<32x128xf32>
    %24 = arith.mulf %23, %23 : vector<32x128xf32>
    %cst_13 = arith.constant dense<0.000000e+00> : vector<128xf32>
    %25 = vector.multi_reduction <add>, %24, %cst_13 [0] : vector<32x128xf32> to vector<128xf32>
    %26 = vector.shape_cast %25 : vector<128xf32> to vector<1x128xf32>
    %c64_i32_14 = arith.constant 64 : i32
    %27 = tpu.dynamic_rotate %26 by %c64_i32_14 dim 1 : vector<1x128xf32>, i32 -> vector<1x128xf32>
    %28 = arith.addf %26, %27 : vector<1x128xf32>
    %c32_i32_15 = arith.constant 32 : i32
    %29 = tpu.dynamic_rotate %28 by %c32_i32_15 dim 1 : vector<1x128xf32>, i32 -> vector<1x128xf32>
    %30 = arith.addf %28, %29 : vector<1x128xf32>
    %c16_i32_16 = arith.constant 16 : i32
    %31 = tpu.dynamic_rotate %30 by %c16_i32_16 dim 1 : vector<1x128xf32>, i32 -> vector<1x128xf32>
    %32 = arith.addf %30, %31 : vector<1x128xf32>
    %c8_i32_17 = arith.constant 8 : i32
    %33 = tpu.dynamic_rotate %32 by %c8_i32_17 dim 1 : vector<1x128xf32>, i32 -> vector<1x128xf32>
    %34 = arith.addf %32, %33 : vector<1x128xf32>
    %cst_18 = arith.constant 0.001953125 : f32
    %35 = vector.broadcast %cst_18 : f32 to vector<1x128xf32>
    %36 = arith.mulf %34, %35 : vector<1x128xf32>
    %c0_19 = arith.constant 0 : index
    %c0_20 = arith.constant 0 : index
    %37 = vector.load %arg2[%c0_19, %c0_20] : memref<2x128xf32, #tpu.memory_space<vmem>>, vector<1x128xf32>
    %cst_21 = arith.constant 9.99999974E-6 : f32
    %38 = vector.broadcast %cst_21 : f32 to vector<1x128xf32>
    %39 = arith.addf %36, %38 : vector<1x128xf32>
    %40 = math.rsqrt %39 : vector<1x128xf32>
    %41 = arith.mulf %37, %40 : vector<1x128xf32>
    %42 = vector.broadcast %41 : vector<1x128xf32> to vector<32x128xf32>
    %43 = arith.mulf %23, %42 : vector<32x128xf32>
    %c1_22 = arith.constant 1 : index
    %c0_23 = arith.constant 0 : index
    %44 = vector.load %arg2[%c1_22, %c0_23] : memref<2x128xf32, #tpu.memory_space<vmem>>, vector<1x128xf32>
    %45 = vector.broadcast %44 : vector<1x128xf32> to vector<32x128xf32>
    %46 = arith.addf %43, %45 : vector<32x128xf32>
    %cst_24 = arith.constant 0.000000e+00 : f32
    %47 = vector.broadcast %cst_24 : f32 to vector<32x128xf32>
    %48 = arith.maximumf %46, %47 : vector<32x128xf32>
    %c0_25 = arith.constant 0 : index
    %c0_26 = arith.constant 0 : index
    %49 = vector.load %arg3[%c0_25, %c0_26] : memref<32x128xf32, #tpu.memory_space<vmem>>, vector<32x128xf32>
    tpu.vector_store %arg3[%c0_25, %c0_26], %48 {strides = array<i32>} : memref<32x128xf32, #tpu.memory_space<vmem>>, vector<32x128xf32>,
    %50 = vector.shape_cast %48 : vector<32x128xf32> to vector<2x2x8x128xf32>
    %cst_27 = arith.constant dense<0xFF800000> : vector<2x8x128xf32>
    %51 = vector.multi_reduction <maximumf>, %50, %cst_27 [1] : vector<2x2x8x128xf32> to vector<2x8x128xf32>
    %52 = vector.shape_cast %51 : vector<2x8x128xf32> to vector<16x128xf32>
    %c64_i32_28 = arith.constant 64 : i32
    %53 = tpu.dynamic_rotate %52 by %c64_i32_28 dim 1 : vector<16x128xf32>, i32 -> vector<16x128xf32>
    %54 = arith.maximumf %52, %53 : vector<16x128xf32>
    %c0_29 = arith.constant 0 : index
    %c0_30 = arith.constant 0 : index
    %55 = vector.load %arg4[%c0_29, %c0_30] : memref<16x128xf32, #tpu.memory_space<vmem>>, vector<16x128xf32>
    tpu.vector_store %arg4[%c0_29, %c0_30], %54 {strides = array<i32>} : memref<16x128xf32, #tpu.memory_space<vmem>>, vector<16x128xf32>,
    return
  }
}

</mosaic_0001>

<bundles_post_ra>
// kernel: tile.13
= control target key start
LH: loop header
LB: loop body
LE: loop exit
PB: predicated region body
PF: predicated region fallthrough
CT: control target
= control target key end

     0   :  { %s28_s0 = inlined_call_operand.vmem [shape: f32[8], index: 0, kind: input, shape index: {}]   ;;  %s29_s1 = inlined_call_operand.vmem [shape: f32[16,8], index: 1, kind: output, shape index: {}]  }
   0x1   :  { %v4_v0 = vld [vmem:[%s28_s0] ss:$0 sm:$0xff] }
   0x2   :  { %5 = vst [vmem:[%s29_s1] sm:$0xff] %v4_v0  ;;  %8 = vst [vmem:[%s29_s1 + $0x8] sm:$0xff] %v4_v0 }

// kernel: tile.18
= control target key start
LH: loop header
LB: loop body
LE: loop exit
PB: predicated region body
PF: predicated region fallthrough
CT: control target
= control target key end

     0   :  { %s131_s10 = smov 120   ;;  %s132_s11 = smov 104   ;;  %vm3_vm0 = vcmask 64512   ;;  %vm9_vm1 = vcmask 1048512   ;;  %vm15_vm2 = vcmask 982912   ;;  %vm21_vm3 = vcmask 917312   ;;  %s207_s0 = inlined_call_operand.vmem [shape: f32[16,8], index: 0, kind: input, shape index: {}]   ;;  %s208_s1 = inlined_call_operand.vmem [shape: f32[1,128], index: 1, kind: output, shape index: {}]  }
   0x1   :  { %v101_v0 = vld [vmem:[%s207_s0 + $0xf] sm:$0x1]   ;;  %v103_v1 = vld [vmem:[%s207_s0 + $0xd] sm:$0x1]   ;;  %v102_v2 = vld [vmem:[%s207_s0 + $0xe] sm:$0x1]  }
   0x2   :  { %7 = vrot.lane.b32.xlu0 %v101_v0, %s131_s10  ;;  %19 = vrot.lane.b32.xlu1 %v103_v1, %s132_s11  ;;  %v104_v3 = vld [vmem:[%s207_s0 + $0xc] sm:$0x1]   ;;  %s133_s16 = smov 112   ;;  %s134_s17 = smov 96   ;;  %v105_v4 = vld [vmem:[%s207_s0 + $0xb] sm:$0x1]  }
   0x3   :  { %v106_v5 = vld [vmem:[%s207_s0 + $0xa] sm:$0x1]   ;;  %v2_v6 = vld [vmem:[%s207_s0] sm:$0x1]   ;;  %s135_s24 = smov 88   ;;  %s136_s25 = smov 80  }
   0x4   :  { %4 = vst.msk [vmem:[#allocation0] sm:$0x1] %vm3_vm0, %v2_v6   ;;  %v107_v7 = vld [vmem:[%s207_s0 + $0x9] sm:$0x1]   ;;  %v108_v8 = vld [vmem:[%s207_s0 + $0x8] sm:$0x1]  }
   0x5   :  { %s137_s30 = smov 72   ;;  %s138_s2 = smov 64   ;;  %v109_v9 = vld [vmem:[%s207_s0 + $0x7] sm:$0x1]   ;;  %v110_v10 = vld [vmem:[%s207_s0 + $0x6] sm:$0x1]  }
   0x6   :  { %13 = vrot.lane.b32.xlu0 %v102_v2, %s133_s16  ;;  %25 = vrot.lane.b32.xlu1 %v104_v3, %s134_s17  ;;  %s139_s7 = smov 56   ;;  %s140_s8 = smov 48   ;;  %v111_v11 = vld [vmem:[%s207_s0 + $0x5] sm:$0x1]   ;;  %v112_v12 = vld [vmem:[%s207_s0 + $0x4] sm:$0x1]  }
   0x7   :  { %s141_s13 = smov 40   ;;  %s142_s14 = smov 32   ;;  %v113_v13 = vld [vmem:[%s207_s0 + $0x3] sm:$0x1]   ;;  %v114_v14 = vld [vmem:[%s207_s0 + $0x2] sm:$0x1]  }
   0x8   :  { %s143_s19 = smov 24   ;;  %s144_s20 = smov 16   ;;  %v115_v15 = vld [vmem:[%s207_s0 + $0x1] sm:$0x1]   ;;  %vm27_vm4 = vcmask 851712   ;;  %vm33_vm5 = vcmask 786112  }
   0x9   :  { %s145_s0 = smov 8   ;;  %vm39_vm6 = vcmask 720512   ;;  %vm45_vm7 = vcmask 654912   ;;  %vm51_vm8 = vcmask 589312   ;;  %vm57_vm9 = vcmask 523712  }
   0xa   :  { %31 = vrot.lane.b32.xlu0 %v105_v4, %s135_s24  ;;  %37 = vrot.lane.b32.xlu1 %v106_v5, %s136_s25  ;;  %vm63_vm10 = vcmask 458112   ;;  %vm69_vm11 = vcmask 392512   ;;  %vm75_vm12 = vcmask 326912   ;;  %vm81_vm13 = vcmask 261312  }
   0xb   :  { %vm87_vm14 = vcmask 195712   ;;  %vm93_vm15 = vcmask 130112  }
   0xe   :  { %43 = vrot.lane.b32.xlu0 %v107_v7, %s137_s30  ;;  %49 = vrot.lane.b32.xlu1 %v108_v8, %s138_s2 }
  0x12   :  { %55 = vrot.lane.b32.xlu0 %v109_v9, %s139_s7  ;;  %61 = vrot.lane.b32.xlu1 %v110_v10, %s140_s8 }
  0x16   :  { %67 = vrot.lane.b32.xlu0 %v111_v11, %s141_s13  ;;  %73 = vrot.lane.b32.xlu1 %v112_v12, %s142_s14 }
  0x1a   :  { %79 = vrot.lane.b32.xlu0 %v113_v13, %s143_s19  ;;  %85 = vrot.lane.b32.xlu1 %v114_v14, %s144_s20 }
  0x1e   :  { %91 = vrot.lane.b32.xlu0 %v115_v15, %s145_s0 }
  0x74   :  { %v8_v16 = vpop.permute.xlu0 %7   ;;  %v20_v17 = vpop.permute.xlu1 %19  }
  0x75   :  { %10 = vst.msk [vmem:[#allocation0] sm:$0x1] %vm9_vm1, %v8_v16  }
  0x78   :  { %v14_v18 = vpop.permute.xlu0 %13   ;;  %v26_v19 = vpop.permute.xlu1 %25  }
  0x79   :  { %16 = vst.msk [vmem:[#allocation0] sm:$0x1] %vm15_vm2, %v14_v18  }
  0x7a   :  { %22 = vst.msk [vmem:[#allocation0] sm:$0x1] %vm21_vm3, %v20_v17  }
  0x7b   :  { %28 = vst.msk [vmem:[#allocation0] sm:$0x1] %vm27_vm4, %v26_v19  }
  0x7c   :  { %v32_v20 = vpop.permute.xlu0 %31   ;;  %v38_v21 = vpop.permute.xlu1 %37  }
  0x7d   :  { %34 = vst.msk [vmem:[#allocation0] sm:$0x1] %vm33_vm5, %v32_v20  }
  0x7e   :  { %40 = vst.msk [vmem:[#allocation0] sm:$0x1] %vm39_vm6, %v38_v21  }
  0x80   :  { %v44_v22 = vpop.permute.xlu0 %43   ;;  %v50_v23 = vpop.permute.xlu1 %49  }
  0x81   :  { %46 = vst.msk [vmem:[#allocation0] sm:$0x1] %vm45_vm7, %v44_v22  }
  0x82   :  { %52 = vst.msk [vmem:[#allocation0] sm:$0x1] %vm51_vm8, %v50_v23  }
  0x84   :  { %v56_v24 = vpop.permute.xlu0 %55   ;;  %v62_v25 = vpop.permute.xlu1 %61  }
  0x85   :  { %58 = vst.msk [vmem:[#allocation0] sm:$0x1] %vm57_vm9, %v56_v24  }
  0x86   :  { %64 = vst.msk [vmem:[#allocation0] sm:$0x1] %vm63_vm10, %v62_v25  }
  0x88   :  { %v68_v26 = vpop.permute.xlu0 %67   ;;  %v74_v27 = vpop.permute.xlu1 %73  }
  0x89   :  { %70 = vst.msk [vmem:[#allocation0] sm:$0x1] %vm69_vm11, %v68_v26  }
  0x8a   :  { %76 = vst.msk [vmem:[#allocation0] sm:$0x1] %vm75_vm12, %v74_v27  }
  0x8c   :  { %v80_v28 = vpop.permute.xlu0 %79   ;;  %v86_v29 = vpop.permute.xlu1 %85  }
  0x8d   :  { %82 = vst.msk [vmem:[#allocation0] sm:$0x1] %vm81_vm13, %v80_v28  }
  0x8e   :  { %88 = vst.msk [vmem:[#allocation0] sm:$0x1] %vm87_vm14, %v86_v29  }
  0x90   :  { %v92_v30 = vpop.permute.xlu0 %91  }
  0x91   :  { %94 = vst.msk [vmem:[#allocation0] sm:$0x1] %vm93_vm15, %v92_v30  }
  0x98   :  { %v98_v31 = vld [vmem:[#allocation0] sm:$0x1] }
  0x99   :  { %100 = vst [vmem:[%s208_s1] sm:$0x1] %v98_v31 }

// kernel: down_forward.1
= control target key start
LH: loop header
LB: loop body
LE: loop exit
PB: predicated region body
PF: predicated region fallthrough
CT: control target
= control target key end

     0   :  { %s594_s22 = smov 32   ;;  %s595_s23 = smov 16   ;;  %s746_s1 = inlined_call_operand.vmem [shape: bf16[384,128], index: 1, kind: input, shape index: {}]   ;;  %s747_s0 = inlined_call_operand.vmem [shape: bf16[3,2,16,128], index: 0, kind: input, shape index: {}]   ;;  %s748_s2 = inlined_call_operand.vmem [shape: f32[2,128], index: 2, kind: input, shape index: {}]   ;;  %s749_s3 = inlined_call_operand.vmem [shape: f32[32,128], index: 3, kind: output, shape index: {0}]   ;;  %s750_s4 = inlined_call_operand.vmem [shape: f32[16,128], index: 4, kind: output, shape index: {1}]  }
   0x1   :  { %v561_v0 = vld [vmem:[%s746_s1 + $0x40] sm:$0xff]   ;;  %v564_v3 = vld [vmem:[%s746_s1 + $0x48] sm:$0xff]   ;;  %v567_v6 = vld [vmem:[%s746_s1 + $0x50] sm:$0xff]   ;;  %s596_s24 = smov 8  }
   0x2   :  { %v562_v1 = vld [vmem:[%s746_s1] sm:$0xff]   ;;  %499 = vmatprep.subr.bf16.mxu0 %v561_v0  ;;  %v565_v4 = vld [vmem:[%s746_s1 + $0x8] sm:$0xff]   ;;  %v568_v7 = vld [vmem:[%s746_s1 + $0x10] sm:$0xff]  }
   0x3   :  { %v563_v2 = vld [vmem:[%s746_s1 + $0x80] sm:$0xff]   ;;  %500 = vmatpush3.bf16.msra.mxu0 %v562_v1  ;;  %v566_v5 = vld [vmem:[%s746_s1 + $0x88] sm:$0xff]   ;;  %v569_v8 = vld [vmem:[%s746_s1 + $0x90] sm:$0xff]   ;;  %v379_v1 = vlaneseq }
   0x4   :  { %537 = vmatprep.subr.bf16.mxu1 %v563_v2  ;;  %501 = vmatprep.subr.bf16.mxu0 %v564_v3  ;;  %v570_v9 = vld [vmem:[%s746_s1 + $0x58] sm:$0xff]   ;;  %v573_v12 = vld [vmem:[%s746_s1 + $0x60] sm:$0xff]   ;;  %v576_v15 = vld [vmem:[%s746_s1 + $0x68] sm:$0xff]  }
   0x5   :  { %538 = vmatpush3.bf16.msra.mxu1 %v563_v2  ;;  %v571_v10 = vld [vmem:[%s746_s1 + $0x18] sm:$0xff]   ;;  %v575_v13 = vld [vmem:[%s746_s1 + $0xa0] sm:$0xff]   ;;  %v578_v16 = vld [vmem:[%s746_s1 + $0xa8] sm:$0xff]   ;;  %v380_v2 = vshrl.u32 %v379_v1, 7 }
   0x6   :  { %539 = vmatprep.subr.bf16.mxu1 %v566_v5  ;;  %v572_v11 = vld [vmem:[%s746_s1 + $0x98] sm:$0xff]   ;;  %v574_v14 = vld [vmem:[%s746_s1 + $0x20] sm:$0xff]   ;;  %v577_v17 = vld [vmem:[%s746_s1 + $0x28] sm:$0xff]  }
   0x7   :  { %502 = vmatpush3.bf16.msra.mxu0 %v565_v4  ;;  %v579_v18 = vld [vmem:[%s746_s1 + $0x70] sm:$0xff]   ;;  %v582_v21 = vld [vmem:[%s746_s1 + $0x78] sm:$0xff]   ;;  %v587_v24 = vld [vmem:[%s747_s0 + $0x20] sm:$0xff]   ;;  %v381_v4 = vsub.s32 0, %v380_v2 }
   0x8   :  { %503 = vmatprep.subr.bf16.mxu0 %v567_v6  ;;  %v580_v19 = vld [vmem:[%s746_s1 + $0x30] sm:$0xff]   ;;  %v584_v23 = vld [vmem:[%s746_s1 + $0xb8] sm:$0xff]   ;;  %553 = vmatprep.mubr.bf16.mxu1 %v587_v24  ;;  %v586_v26 = vld [vmem:[%s747_s0] sm:$0xff]  }
   0x9   :  { %540 = vmatpush3.bf16.msra.mxu1 %v566_v5  ;;  %v581_v20 = vld [vmem:[%s746_s1 + $0xb0] sm:$0xff]   ;;  %v583_v25 = vld [vmem:[%s746_s1 + $0x38] sm:$0xff]   ;;  %v588_v28 = vld [vmem:[%s747_s0 + $0x28] sm:$0xff]  }
   0xa   :  { %541 = vmatprep.subr.bf16.mxu1 %v569_v8  ;;  %v585_v22 = vld [vmem:[%s747_s0 + $0x10] sm:$0xff]   ;;  %v589_v27 = vld [vmem:[%s747_s0 + $0x18] sm:$0xff]   ;;  %v590_v29 = vld [vmem:[%s747_s0 + $0x8] sm:$0xff]   ;;  %s593_s0 = smov 64  }
   0xb   :  { %504 = vmatpush3.bf16.msra.mxu0 %v568_v7  ;;  %291 = vmatprep.mubr.bf16.mxu0 %v585_v22 }
   0xc   :  { %505 = vmatprep.subr.bf16.mxu0 %v570_v9 }
   0xd   :  { %542 = vmatpush3.bf16.msra.mxu1 %v569_v8 }
   0xe   :  { %543 = vmatprep.subr.bf16.mxu1 %v572_v11 }
   0xf   :  { %506 = vmatpush3.bf16.msra.mxu0 %v571_v10 }
  0x10   :  { %507 = vmatprep.subr.bf16.mxu0 %v573_v12 }
  0x11   :  { %544 = vmatpush3.bf16.msra.mxu1 %v572_v11 }
  0x12   :  { %545 = vmatprep.subr.bf16.mxu1 %v575_v13 }
  0x13   :  { %508 = vmatpush3.bf16.msra.mxu0 %v574_v14 }
  0x14   :  { %509 = vmatprep.subr.bf16.mxu0 %v576_v15 }
  0x15   :  { %546 = vmatpush3.bf16.msra.mxu1 %v575_v13 }
  0x16   :  { %547 = vmatprep.subr.bf16.mxu1 %v578_v16 }
  0x17   :  { %510 = vmatpush3.bf16.msra.mxu0 %v577_v17 }
  0x18   :  { %511 = vmatprep.subr.bf16.mxu0 %v579_v18 }
  0x19   :  { %548 = vmatpush3.bf16.msra.mxu1 %v578_v16 }
  0x1a   :  { %549 = vmatprep.subr.bf16.mxu1 %v581_v20 }
  0x1b   :  { %512 = vmatpush3.bf16.msra.mxu0 %v580_v19 }
  0x1c   :  { %513 = vmatprep.subr.bf16.mxu0 %v582_v21 }
  0x1d   :  { %550 = vmatpush3.bf16.msra.mxu1 %v581_v20 }
  0x1e   :  { %551 = vmatprep.subr.bf16.mxu1 %v584_v23 }
  0x1f   :  { %514 = vmatpush3.bf16.msra.mxu0 %v583_v25 }
  0x21   :  { %552 = vmatpush3.bf16.msra.mxu1 %v584_v23 }
  0x22   :  { %292 = vmatmul.mubr.bf16.vlgmr.msra.gmra.mrb[0].mxu0 %v586_v26 }
  0x23   :  { %299 = vmatprep.mubr.bf16.mxu0 %v589_v27 }
  0x24   :  { %554 = vmatmul.mubr.bf16.vlgmr.msra.gmra.mrb[0].mxu1 %v588_v28 }
  0x2a   :  { %300 = vmatmul.mubr.bf16.gmra.mrb[4].mxu0 %v590_v29 }
  0xf5   :  { %v515_v30 = vpop.f32.mrb[0].mxu0 }
  0xf6   :  { %v516_v31 = vpop.f32.mrb[1].mxu0 }
  0xf7   :  { %v517_v32 = vadd.f32 %v516_v31, %v515_v30  ;;  %v518_v33 = vpop.f32.mrb[2].mxu0  ;;  %v555_v34 = vpop.f32.mrb[0].mxu1 }
  0xf8   :  { %v519_v35 = vpop.f32.mrb[3].mxu0  ;;  %v342_v36 = vpop.f32.mrb[1].mxu1 }
  0xf9   :  { %v520_v37 = vadd.f32 %v519_v35, %v518_v33  ;;  %v343_v38 = vadd.f32 %v517_v32, %v342_v36  ;;  %v556_v39 = vpop.f32.mrb[2].mxu1  ;;  %v413_v35 = vld [vmem:[%s748_s2] sm:$0x1] }
  0xfa   :  { %v345_v40 = vpop.f32.mrb[3].mxu1 }
  0xfb   :  { %v346_v41 = vadd.f32 %v520_v37, %v345_v40 }
  0xfd   :  { %v521_v42 = vpop.f32.mrb[4].mxu0  ;;  %v357_v47 = vadd.f32 %v346_v41, %v343_v38 }
  0xfe   :  { %v522_v43 = vpop.f32.mrb[5].mxu0 }
  0xff   :  { %v523_v44 = vadd.f32 %v522_v43, %v521_v42  ;;  %v524_v45 = vpop.f32.mrb[6].mxu0 }
 0x100   :  { %v525_v46 = vpop.f32.mrb[7].mxu0 }
 0x101   :  { %v351_v48 = vadd.f32 %v555_v34, %v523_v44  ;;  %v526_v49 = vadd.f32 %v525_v46, %v524_v45 }
 0x103   :  { %v358_v50 = vadd.f32 %v357_v47, %v351_v48  ;;  %v354_v51 = vadd.f32 %v556_v39, %v526_v49  ;;  %v498_v39 = vld [vmem:[%s748_s2 + $0x1] ss:$0 sm:$0xff] }
 0x105   :  { %v359_v52 = vadd.f32 %v358_v50, %v354_v51 }
 0x107   :  { %v360_v53 = vrot.slane %v359_v52, 4 }
 0x109   :  { %v361_v54 = vadd.f32 %v360_v53, %v359_v52 }
 0x10b   :  { %v362_v55 = vrot.slane %v361_v54, 2 }
 0x10d   :  { %v363_v56 = vadd.f32 %v362_v55, %v361_v54 }
 0x10f   :  { %v364_v57 = vrot.slane %v363_v56, 1 }
 0x111   :  { %v365_v58 = vadd.f32 %v364_v57, %v363_v56 }
 0x113   :  { %366 = vrot.lane.b32.xlu0 %v365_v58, %s593_s0 }
 0x185   :  { %v367_v59 = vpop.permute.xlu0 %366 }
 0x186   :  { %v368_v60 = vadd.f32 %v367_v59, %v365_v58 }
 0x188   :  { %369 = vrot.lane.b32.xlu0 %v368_v60, %s594_s22 }
 0x1fa   :  { %v370_v61 = vpop.permute.xlu0 %369 }
 0x1fb   :  { %v371_v62 = vadd.f32 %v370_v61, %v368_v60 }
 0x1fd   :  { %372 = vrot.lane.b32.xlu1 %v371_v62, %s595_s23 }
 0x26f   :  { %v373_v63 = vpop.permute.xlu1 %372 }
 0x270   :  { %v374_v0 = vadd.f32 %v373_v63, %v371_v62 }
 0x272   :  { %375 = vrot.lane.b32.xlu1 %v374_v0, %s596_s24 }
 0x2e4   :  { %v376_v3 = vpop.permute.xlu1 %375 }
 0x2e5   :  { %v377_v5 = vadd.f32 %v376_v3, %v374_v0 }
 0x2e7   :  { %v378_v6 = vmul.f32 0.001953125, %v377_v5 }
 0x2e9   :  { %v382_v7 = vrot.slane %v378_v6, %v381_v4 }
 0x2eb   :  { %v383_v8 = vsub.f32 %v343_v38, %v382_v7  ;;  %v384_v9 = vsub.f32 %v346_v41, %v382_v7  ;;  %v385_v10 = vsub.f32 %v351_v48, %v382_v7  ;;  %v386_v11 = vsub.f32 %v354_v51, %v382_v7 }
 0x2ed   :  { %v387_v12 = vmul.f32 %v383_v8, %v383_v8  ;;  %v388_v13 = vmul.f32 %v384_v9, %v384_v9  ;;  %v389_v14 = vmul.f32 %v385_v10, %v385_v10  ;;  %v390_v16 = vmul.f32 %v386_v11, %v386_v11 }
 0x2ef   :  { %v391_v15 = vadd.f32 %v388_v13, %v387_v12 }
 0x2f1   :  { %v392_v17 = vadd.f32 %v391_v15, %v389_v14 }
 0x2f3   :  { %v393_v18 = vadd.f32 %v392_v17, %v390_v16 }
 0x2f5   :  { %v394_v19 = vrot.slane %v393_v18, 4 }
 0x2f7   :  { %v395_v20 = vadd.f32 %v394_v19, %v393_v18 }
 0x2f9   :  { %v396_v21 = vrot.slane %v395_v20, 2 }
 0x2fb   :  { %v397_v22 = vadd.f32 %v396_v21, %v395_v20 }
 0x2fd   :  { %v398_v23 = vrot.slane %v397_v22, 1 }
 0x2ff   :  { %v399_v24 = vadd.f32 %v398_v23, %v397_v22 }
 0x301   :  { %400 = vrot.lane.b32.xlu0 %v399_v24, %s593_s0 }
 0x373   :  { %v401_v25 = vpop.permute.xlu0 %400 }
 0x374   :  { %v402_v26 = vadd.f32 %v401_v25, %v399_v24 }
 0x376   :  { %403 = vrot.lane.b32.xlu1 %v402_v26, %s594_s22 }
 0x3e8   :  { %v404_v27 = vpop.permute.xlu1 %403 }
 0x3e9   :  { %v405_v28 = vadd.f32 %v404_v27, %v402_v26 }
 0x3eb   :  { %406 = vrot.lane.b32.xlu0 %v405_v28, %s595_s23 }
 0x45d   :  { %v407_v29 = vpop.permute.xlu0 %406 }
 0x45e   :  { %v408_v30 = vadd.f32 %v407_v29, %v405_v28 }
 0x460   :  { %409 = vrot.lane.b32.xlu1 %v408_v30, %s596_s24 }
 0x4d2   :  { %v410_v31 = vpop.permute.xlu1 %409 }
 0x4d3   :  { %v411_v32 = vadd.f32 %v410_v31, %v408_v30 }
 0x4d5   :  { %v412_v33 = vmul.f32 0.001953125, %v411_v32 }
 0x4d7   :  { %v414_v34 = vadd.f32 1e-05, %v412_v33 }
 0x4d9   :  { %591 = vrsqrt.f32 %v414_v34 }
 0x4e3   :  { %v592_v36 = vpop.eup %591 }
 0x4e4   :  { %v416_v37 = vmul.f32 %v592_v36, %v413_v35 }
 0x4e6   :  { %v420_v38 = vrot.slane %v416_v37, %v381_v4 }
 0x4e8   :  { %v423_v40 = vmul.f32 %v420_v38, %v385_v10  ;;  %v424_v41 = vmul.f32 %v420_v38, %v386_v11  ;;  %v421_v42 = vmul.f32 %v420_v38, %v383_v8  ;;  %v422_v43 = vmul.f32 %v420_v38, %v384_v9 }
 0x4ea   :  { %v432_v44 = vadd.f32 %v498_v39, %v423_v40  ;;  %v433_v45 = vadd.f32 %v498_v39, %v424_v41  ;;  %v430_v46 = vadd.f32 %v498_v39, %v421_v42  ;;  %v431_v47 = vadd.f32 %v498_v39, %v422_v43 }
 0x4ec   :  { %v436_v48 = vmax.f32 %v432_v44, 0.0  ;;  %v437_v49 = vmax.f32 %v433_v45, 0.0  ;;  %v434_v50 = vmax.f32 %v430_v46, 0.0  ;;  %v435_v51 = vmax.f32 %v431_v47, 0.0 }
 0x4ee   :  { %441 = vst [vmem:[%s749_s3 + $0x18] sm:$0xff] %v437_v49  ;;  %v443_v52 = vmax.f32 %v436_v48, %v437_v49  ;;  %440 = vst [vmem:[%s749_s3 + $0x10] sm:$0xff] %v436_v48  ;;  %v442_v53 = vmax.f32 %v434_v50, %v435_v51 }
 0x4ef   :  { %439 = vst [vmem:[%s749_s3 + $0x8] sm:$0xff] %v435_v51  ;;  %438 = vst [vmem:[%s749_s3] sm:$0xff] %v434_v50 }
 0x4f0   :  { %446 = vrot.lane.b32.xlu1 %v443_v52, %s593_s0  ;;  %444 = vrot.lane.b32.xlu0 %v442_v53, %s593_s0 }
 0x562   :  { %v447_v54 = vpop.permute.xlu1 %446  ;;  %v445_v55 = vpop.permute.xlu0 %444 }
 0x563   :  { %v449_v56 = vmax.f32 %v443_v52, %v447_v54  ;;  %v448_v57 = vmax.f32 %v442_v53, %v445_v55 }
 0x565   :  { %451 = vst [vmem:[%s750_s4 + $0x8] sm:$0xff] %v449_v56  ;;  %450 = vst [vmem:[%s750_s4] sm:$0xff] %v448_v57 }

</bundles_post_ra>
